<compile_context>
chip_gen: v6e
topology: v6e:2x2x1
jax: 0.10.0
libtpu: 0.0.40
codegen_flags: <defaults>
</compile_context>

<pallas_src>
import functools

import jax
import jax.numpy as jnp
from jax.experimental import pallas as pl
from jax.experimental.pallas import tpu as pltpu


def _kmeans_min_kernel(z_ref, sv_ref, out_ref, *, length, tile_l, n_l_tiles):
    """Fold min-over-L of the scaled squared distance into out_ref.

    z_ref:   (tile_l, tile_d)  input slab (input dtype; upcast here)
    sv_ref:  (2, tile_d)       row 0: -2*S1/C, row 1: S2/C   (f32)
    out_ref: (1, tile_d)       running min of (1/C)*sum_c(z-mu_c)^2 (f32, resident across L)
    """
    l_idx = pl.program_id(1)

    @pl.when(l_idx == 0)
    def _():
        out_ref[...] = jnp.full(out_ref.shape, jnp.inf, dtype=out_ref.dtype)

    z = z_ref[...].astype(jnp.float32)          # (tile_l, tile_d)
    sv = sv_ref[...]                            # (2, tile_d)
    ns1 = sv[0:1, :]                            # (1, tile_d) == -2*S1/C
    s2p = sv[1:2, :]                            # (1, tile_d) ==  S2/C

    # (1/C) * sum_c (z - mu_c)^2  -> 1 vmul + 2 vadds per element (sqrt/clamp hoisted out).
    acc = z * (z + ns1) + s2p                   # (tile_l, tile_d)

    def _fold(vals):
        out_ref[...] = jnp.minimum(out_ref[...], jnp.min(vals, axis=0, keepdims=True))

    if length % tile_l == 0:
        # No L padding exists anywhere -> no mask at all.
        _fold(acc)
    else:
        # Only the last L tile carries garbage tail rows; mask (cheap (tile_l,1) iota) there only.
        n_valid_last = length - (n_l_tiles - 1) * tile_l

        @pl.when(l_idx != n_l_tiles - 1)
        def _():
            _fold(acc)

        @pl.when(l_idx == n_l_tiles - 1)
        def _():
            row = jax.lax.broadcasted_iota(jnp.int32, (tile_l, 1), 0)
            _fold(jnp.where(row < n_valid_last, acc, jnp.inf))


def _cdiv(a, b):
    return (a + b - 1) // b


def _round_up(a, m):
    return ((a + m - 1) // m) * m


def kmeans_clustering_loss(z: jax.Array, mu: jax.Array, *, tile_l: int = 2048,
                           tile_d: int = 2048) -> jax.Array:
    """z: (length, 1, dim), mu: (clusters, dim) -> scalar f32 loss."""
    length, one, dim = z.shape
    assert one == 1, "module semantics require z of shape (length, 1, dim)"
    clusters, dim2 = mu.shape
    assert dim2 == dim

    z2d = z.reshape(length, dim)  # keep the input dtype on the HBM stream (bf16 stays bf16)

    # Tiny per-d cluster sums, pre-scaled so the kernel hot loop has no constant multiplies.
    mu_f32 = mu.astype(jnp.float32)
    inv_c = 1.0 / float(clusters)
    ns1 = (-2.0 * inv_c) * jnp.sum(mu_f32, axis=0)              # (dim,)
    s2p = inv_c * jnp.sum(mu_f32 * mu_f32, axis=0)              # (dim,)
    sv = jnp.stack([ns1, s2p], axis=0)                          # (2, dim) f32

    # Balanced tiles (last tile nearly full), respecting (8, 128) granularity.
    tl = _round_up(_cdiv(length, _cdiv(length, tile_l)), 8)
    td = _round_up(_cdiv(dim, _cdiv(dim, tile_d)), 128)
    # Megacore (v7x): make sure the parallel D axis has >= 2 tiles when dim allows it.
    # TODO(synk): for dim < 256 on v7x, split L across cores via a (2, d_pad) partial-min output.
    if _cdiv(dim, td) == 1 and dim >= 256:
        td = _round_up(_cdiv(dim, 2), 128)
    n_l = _cdiv(length, tl)
    n_d = _cdiv(dim, td)
    d_pad = n_d * td

    sv_p = jnp.pad(sv, ((0, 0), (0, d_pad - dim)))              # tiny (2, d_pad)

    # VMEM budget from the actual double-buffered tile footprint, per-generation cap.
    z_tile_bytes = tl * td * z2d.dtype.itemsize
    vmem_needed = 2 * z_tile_bytes + 2 * (2 * td * 4) + 2 * (td * 4)
    try:
        vmem_cap = int(pltpu.get_tpu_info().vmem_capacity_bytes)
    except Exception:
        vmem_cap = 64 * 1024 * 1024
    vmem_limit = int(min(max(2 * vmem_needed, 32 * 1024 * 1024), int(0.85 * vmem_cap)))
    vmem_limit = max(vmem_limit, vmem_needed + (1 << 20))

    kernel = functools.partial(_kmeans_min_kernel, length=length, tile_l=tl, n_l_tiles=n_l)

    min_sq = pl.pallas_call(
        kernel,
        out_shape=jax.ShapeDtypeStruct((1, d_pad), jnp.float32),
        grid=(n_d, n_l),                                     # D (parallel) outer, L (reduction) last
        in_specs=[
            pl.BlockSpec((tl, td), lambda d, l: (l, d)),     # z tile (edge blocks partial, no pad)
            pl.BlockSpec((2, td), lambda d, l: (0, d)),      # [-2*S1/C ; S2/C] broadcast vectors
        ],
        # Constant block index across the L axis -> output-resident min accumulator.
        out_specs=pl.BlockSpec((1, td), lambda d, l: (0, d)),
        compiler_params=pltpu.CompilerParams(
            dimension_semantics=("parallel", "arbitrary"),
            vmem_limit_bytes=vmem_limit,
        ),
    )(z2d, sv_p)

    # Epilogue on a tiny (dim,) vector: undo the 1/C scaling, clamp, sqrt, mean.
    min_sq_valid = min_sq[0, :dim]
    dist_min = jnp.sqrt(jnp.maximum(min_sq_valid * float(clusters), 0.0))
    return jnp.mean(dist_min)


def kmeans_clustering_loss_ref(z: jax.Array, mu: jax.Array) -> jax.Array:
    """Plain-JAX reference mirroring the PyTorch module literally."""
    zb = z[:, 0, :].astype(jnp.float32)                    # (L, D)
    muf = mu.astype(jnp.float32)                           # (C, D)
    diff = zb[:, None, :] - muf[None, :, :]                # (L, C, D)
    dist = jnp.sqrt(jnp.sum(diff * diff, axis=1))          # (L, D)  norm over clusters (dim=2)
    return jnp.mean(jnp.min(dist, axis=0))                 # min over length (dim=1), then mean


if __name__ == "__main__":
    key = jax.random.PRNGKey(0)
    kz, km, kz2, km2 = jax.random.split(key, 4)

    # Small shapes consistent with the module: z (length, 1, dim), mu (clusters, dim).
    length, dim, clusters = 8, 32, 4
    z = jax.random.normal(kz, (length, 1, dim), dtype=jnp.float32)
    mu = jax.random.normal(km, (clusters, dim), dtype=jnp.float32)
    loss = kmeans_clustering_loss(z, mu)
    jax.block_until_ready(loss)
    ref = kmeans_clustering_loss_ref(z, mu)
    assert jnp.allclose(loss, ref, rtol=1e-4, atol=1e-5), (loss, ref)

    # Non-aligned L/D exercise the unpadded partial-edge-block + last-L-tile masking path.
    z2 = jax.random.normal(kz2, (37, 1, 200), dtype=jnp.float32)
    mu2 = jax.random.normal(km2, (5, 200), dtype=jnp.float32)
    loss2 = kmeans_clustering_loss(z2, mu2)
    jax.block_until_ready(loss2)
    ref2 = kmeans_clustering_loss_ref(z2, mu2)
    assert jnp.allclose(loss2, ref2, rtol=1e-4, atol=1e-5), (loss2, ref2)

    print("KERNEL_OK")
</pallas_src>

<mosaic_0001>
module attributes {stable_mosaic.version = 11 : i64} {
  func.func @_kmeans_min_kernel(%arg0: i32, %arg1: i32, %arg2: memref<8x128xf32, #tpu.memory_space<vmem>>, %arg3: memref<2x128xf32, #tpu.memory_space<vmem>>, %arg4: memref<1x128xf32, #tpu.memory_space<vmem>>) attributes {dimension_semantics = [#tpu.dimension_semantics<parallel>, #tpu.dimension_semantics<arbitrary>], iteration_bounds = array<i64: 1, 1>, scalar_prefetch = 0 : i64, scratch_operands = 0 : i64, tpu.core_type = #tpu.core_type<tc>, window_params = [{transform_indices = @transform_0, window_bounds = array<i64: 8, 128>}, {transform_indices = @transform_1, window_bounds = array<i64: 2, 128>}, {transform_indices = @transform_2, window_bounds = array<i64: 1, 128>}]} {
    %c0_i32 = arith.constant 0 : i32
    %0 = arith.cmpi eq, %arg1, %c0_i32 : i32
    %1 = arith.extui %0 : i1 to i32
    %c0_i32_0 = arith.constant 0 : i32
    %2 = arith.cmpi ne, %1, %c0_i32_0 : i32
    scf.if %2 {
      %cst_8 = arith.constant 0x7F800000 : f32
      %17 = vector.broadcast %cst_8 : f32 to vector<1x128xf32>
      %c0_9 = arith.constant 0 : index
      %c0_10 = arith.constant 0 : index
      %18 = vector.load %arg4[%c0_9, %c0_10] : memref<1x128xf32, #tpu.memory_space<vmem>>, vector<1x128xf32>
      tpu.vector_store %arg4[%c0_9, %c0_10], %17 {strides = array<i32>} : memref<1x128xf32, #tpu.memory_space<vmem>>, vector<1x128xf32>,
    } else {
    }
    %c0 = arith.constant 0 : index
    %c0_1 = arith.constant 0 : index
    %3 = vector.load %arg2[%c0, %c0_1] : memref<8x128xf32, #tpu.memory_space<vmem>>, vector<8x128xf32>
    %c0_2 = arith.constant 0 : index
    %c0_3 = arith.constant 0 : index
    %4 = vector.load %arg3[%c0_2, %c0_3] : memref<2x128xf32, #tpu.memory_space<vmem>>, vector<2x128xf32>
    %5 = vector.extract_strided_slice %4 {offsets = [0, 0], sizes = [1, 128], strides = [1, 1]} : vector<2x128xf32> to vector<1x128xf32>
    %6 = vector.extract_strided_slice %4 {offsets = [1, 0], sizes = [1, 128], strides = [1, 1]} : vector<2x128xf32> to vector<1x128xf32>
    %7 = vector.broadcast %5 : vector<1x128xf32> to vector<8x128xf32>
    %8 = arith.addf %3, %7 : vector<8x128xf32>
    %9 = arith.mulf %3, %8 : vector<8x128xf32>
    %10 = vector.broadcast %6 : vector<1x128xf32> to vector<8x128xf32>
    %11 = arith.addf %9, %10 : vector<8x128xf32>
    %c0_4 = arith.constant 0 : index
    %c0_5 = arith.constant 0 : index
    %12 = vector.load %arg4[%c0_4, %c0_5] : memref<1x128xf32, #tpu.memory_space<vmem>>, vector<1x128xf32>
    %cst = arith.constant dense<0x7F800000> : vector<128xf32>
    %13 = vector.multi_reduction <minimumf>, %11, %cst [0] : vector<8x128xf32> to vector<128xf32>
    %14 = vector.shape_cast %13 : vector<128xf32> to vector<1x128xf32>
    %15 = arith.minimumf %12, %14 : vector<1x128xf32>
    %c0_6 = arith.constant 0 : index
    %c0_7 = arith.constant 0 : index
    %16 = vector.load %arg4[%c0_6, %c0_7] : memref<1x128xf32, #tpu.memory_space<vmem>>, vector<1x128xf32>
    tpu.vector_store %arg4[%c0_6, %c0_7], %15 {strides = array<i32>} : memref<1x128xf32, #tpu.memory_space<vmem>>, vector<1x128xf32>,
    return
  }
  func.func @transform_0(%arg0: i32, %arg1: i32) -> (i32, i32) {
    %c0_i32 = arith.constant 0 : i32
    return %arg1, %arg0 : i32, i32
  }
  func.func @transform_1(%arg0: i32, %arg1: i32) -> (i32, i32) {
    %c0_i32 = arith.constant 0 : i32
    %c0_i32_0 = arith.constant 0 : i32
    return %c0_i32, %arg0 : i32, i32
  }
  func.func @transform_2(%arg0: i32, %arg1: i32) -> (i32, i32) {
    %c0_i32 = arith.constant 0 : i32
    %c0_i32_0 = arith.constant 0 : i32
    return %c0_i32, %arg0 : i32, i32
  }
}

</mosaic_0001>

<bundles_post_ra>
// kernel: tpu_custom_call.1
= control target key start
LH: loop header
LB: loop body
LE: loop exit
PB: predicated region body
PF: predicated region fallthrough
CT: control target
= control target key end

     0   :  { %7 = vsyncpa [#allocation3], 0  ;;  %s177_s0 = inlined_call_operand.hbm [shape: f32[8,32], index: 0, kind: input, shape index: {}]   ;;  %s178_s1 = inlined_call_operand.hbm [shape: f32[2,128], index: 1, kind: input, shape index: {}]   ;;  %s179_s2 = inlined_call_operand.hbm [shape: f32[1,128], index: 2, kind: output, shape index: {}]  }
   0x1   :  { %8 = vsyncpa [#allocation6], 0 }
   0x2   :  { %9 = vsyncpa [#allocation4], 0  ;;  %s149_s9 = smov [#allocation2]   ;;  %s150_s11 = smov [#allocation5]  }
   0x3   :  { %s16_s10 = sshll.u32 %s149_s9, 4  ;;  %s26_s12 = sshll.u32 %s150_s11, 4  ;;  %s17_s10 = int_to_ptr.vmem [resolvable:$true] %s16_s10  ;;  %s27_s12 = int_to_ptr.vmem [resolvable:$true] %s26_s12 }
   0x4   :  { %s91_s13 = scalar_lea.vmem %s17_s10, 128  ;;  %p96_p1 = scmp.lt.s32.totalorder %s17_s10, %s17_s10 }
   0x5   :  { %p92_p0 = scmp.ne.s32.totalorder %s17_s10, %s91_s13  ;;  %p97_p2 = scmp.lt.s32.totalorder %s91_s13, %s91_s13 }
   0x7   :  { %p98_p3 = por %p97_p2, %p96_p1 }
   0x9   :  { %p99_p4 = pnand %p98_p3, %p92_p0 }
   0xb   :  { %102 = shalt.err (!%p99_p4)
}
   0xc   :  { %19 = dma.hbm_to_vmem [thread:$0]  %s177_s0, 128, %s17_s10, [#allocation3]  }
   0xd   :  { %s111_s16 = scalar_lea.vmem %s27_s12, 32  ;;  %p116_p6 = scmp.lt.s32.totalorder %s27_s12, %s27_s12 }
   0xe   :  { %p112_p5 = scmp.ne.s32.totalorder %s27_s12, %s111_s16  ;;  %p117_p7 = scmp.lt.s32.totalorder %s111_s16, %s111_s16 }
  0x10   :  { %p118_p8 = por %p117_p7, %p116_p6 }
  0x12   :  { %p119_p9 = pnand %p118_p8, %p112_p5 }
  0x14   :  { %122 = shalt.err (!%p119_p9)
}
  0x15   :  { %29 = dma.hbm_to_vmem [thread:$0]  %s178_s1, 32, %s27_s12, [#allocation6]  }
  0x16   :  { %143 = dma.done.wait [#allocation3], 128  }
  0x17   :  { %144 = vsyncadd [#allocation3], 4294967168 }
  0x18   :  { %145 = dma.done.wait [#allocation6], 32  }
  0x19   :  { %146 = vsyncadd [#allocation6], 4294967264  ;;  %v43_v0 = vlaneseq  ;;  %v151_v1 = vmov inf   ;;  %v41_v5 = vld [vmem:[#allocation2] sm:$0xff]  ;;  %v42_v6 = vld [vmem:[#allocation5] sm:$0x3] }
  0x1a   :  { %40 = vst [vmem:[#allocation7] sm:$0x1] %v151_v1  ;;  %s152_s0 = smov [#allocation7]  }
  0x1b   :  { %v44_v2 = vshrl.u32 %v43_v0, 7  ;;  %s69_s1 = sshll.u32 %s152_s0, 4  ;;  %s70_s1 = int_to_ptr.vmem [resolvable:$true] %s69_s1 }
  0x1c   :  { %s123_s19 = scalar_lea.vmem %s70_s1, 16  ;;  %s127_s20 = scalar_lea.vmem %s70_s1, 32 }
  0x1d   :  { %v45_v3 = vsub.s32 0, %v44_v2  ;;  %v51_v4 = vsub.s32 1, %v44_v2  ;;  %p124_p10 = scmp.ne.s32.totalorder %s70_s1, %s123_s19  ;;  %p128_p11 = scmp.lt.s32.totalorder %s70_s1, %s70_s1 }
  0x1e   :  { %p129_p12 = scmp.lt.s32.totalorder %s127_s20, %s123_s19 }
  0x1f   :  { %v46_v7 = vrot.slane %v42_v6, %v45_v3  ;;  %v52_v9 = vrot.slane %v42_v6, %v51_v4 }
  0x20   :  { %p130_p13 = por %p129_p12, %p128_p11 }
  0x21   :  { %v47_v8 = vadd.f32 %v46_v7, %v41_v5  ;;  %v54_v17 = vld [vmem:[#allocation7] sm:$0x1] }
  0x22   :  { %p131_p0 = pnand %p130_p13, %p124_p10 }
  0x23   :  { %v48_v10 = vmul.f32 %v47_v8, %v41_v5 }
  0x25   :  { %v53_v11 = vadd.f32 %v52_v9, %v48_v10 }
  0x27   :  { %v55_v12 = vrot.slane %v53_v11, 4 }
  0x29   :  { %v56_v13 = vmin.f32 %v53_v11, %v55_v12 }
  0x2b   :  { %v57_v14 = vrot.slane %v56_v13, 2 }
  0x2d   :  { %v58_v15 = vmin.f32 %v56_v13, %v57_v14 }
  0x2f   :  { %v59_v16 = vrot.slane %v58_v15, 1 }
  0x31   :  { %v60_v18 = vmin.f32 %v58_v15, %v59_v16 }
  0x33   :  { %v61_v19 = vmin.f32 %v54_v17, %v60_v18 }
  0x35   :  { %62 = vst [vmem:[#allocation7] sm:$0x1] %v61_v19 }
  0x36   :  { %134 = shalt.err (!%p131_p0)
}
  0x37   :  { %72 = dma.vmem_to_hbm [thread:$0]  %s70_s1, 16, %s179_s2, [#allocation4]  }
  0x38   :  { %147 = dma.done.wait [#allocation4], 16  }
  0x39   :  { %148 = vsyncadd [#allocation4], 4294967280 }
  0x3a   :  { %76 = vsyncpa [#allocation3], 1 }
  0x3b   :  { %77 = vsyncpa [#allocation6], 1 }
  0x3c   :  { %78 = vsyncpa [#allocation4], 1 }

</bundles_post_ra>
